<compile_context>
chip_gen: v7x
topology: tpu7x:2x2x1
jax: 0.10.0
libtpu: 0.0.40
codegen_flags: <defaults>
</compile_context>

<pallas_src>
import math

import jax
import jax.numpy as jnp
from jax.experimental import pallas as pl
from jax.experimental.pallas import tpu as pltpu


def mdn_loss_kernel(mu_ref, sigma_ref, pi_ref, tgt_ref, out_ref):
    # Block layouts (lane axis = batch block BB, sublane axis = W):
    #   mu_ref, sigma_ref : (K, D, W, BB)
    #   pi_ref            : (K, W, BB)
    #   tgt_ref           : (M, D, W, BB)
    #   out_ref           : (1, BB)
    mu = mu_ref[...].astype(jnp.float32)
    sigma = sigma_ref[...].astype(jnp.float32)
    logits = pi_ref[...].astype(jnp.float32)
    tgt = tgt_ref[...].astype(jnp.float32)

    K, D, W, BB = mu.shape
    M = tgt.shape[0]

    # Hoisted, exact reciprocal: one divide pass, multiplies everywhere else.
    inv_sigma = 1.0 / sigma                                          # (K, D, W, BB)
    log_sigma_sum = jnp.sum(jnp.log(sigma), axis=1)                  # (K, W, BB)
    norm_const = 0.5 * D * math.log(2.0 * math.pi)

    # log_softmax over mixture components K (leading axis -> elementwise vreg ops).
    lmax = jnp.max(logits, axis=0, keepdims=True)                    # (1, W, BB)
    log_mix = logits - lmax - jnp.log(
        jnp.sum(jnp.exp(logits - lmax), axis=0, keepdims=True))      # (K, W, BB)

    # Mahalanobis term, vectorized over all M targets and K components at once.
    # Only the tiny event dim D (=2) is statically unrolled (keeps rank <= 4).
    quad = None
    for d in range(D):
        zd = (tgt[:, d][:, None] - mu[:, d][None]) * inv_sigma[:, d][None]
        quad = zd * zd if quad is None else quad + zd * zd           # (M, K, W, BB)

    comp_lp = -0.5 * quad - log_sigma_sum[None] - norm_const         # (M, K, W, BB)
    joint = comp_lp + log_mix[None]                                  # (M, K, W, BB)

    # logsumexp over K (axis 1, leading -> pure VPU max/add, one exp/log pass).
    jmax = jnp.max(joint, axis=1, keepdims=True)                     # (M, 1, W, BB)
    lp = jmax[:, 0] + jnp.log(jnp.sum(jnp.exp(joint - jmax), axis=1))  # (M, W, BB)

    # Single final reduction: sum over M (leading, cheap) then one sublane reduce
    # over W; write the whole lane-dense (1, BB) row at once.
    lp_sum = jnp.sum(jnp.sum(lp, axis=0), axis=0, keepdims=True)     # (1, BB)
    out_ref[...] = -(lp_sum * (1.0 / (M * W)))


def mdn_loss_pallas(mu, sigma, pi, targets, target_is_wh, waypoints_ix,
                    batch_block=256):
    """mu/sigma: (B,W,K,D), pi: (B,W,K), targets: (B,M,T,D) -> loss (B,)."""
    B, W, K, D = mu.shape

    # Glue (plain JAX, fused by XLA): waypoint gather + optional wh flip.
    # TODO(synk): the data-dependent waypoint gather stays outside the kernel; a
    # static BlockSpec cannot express it without scalar prefetch.
    tgt = targets[:, :, waypoints_ix, :]                  # (B, M, W, D)
    if target_is_wh:
        tgt = jnp.flip(tgt, axis=-1)
    M = tgt.shape[1]

    # Batch blocking: whole batch in one grid step when small; otherwise
    # 128-lane-aligned blocks.  Pad with benign values so padded lanes stay finite
    # (they are never reduced across and their output columns are sliced away).
    BB = min(B, batch_block)
    Bp = ((B + BB - 1) // BB) * BB
    if Bp != B:
        pad = Bp - B
        mu = jnp.pad(mu, ((0, pad), (0, 0), (0, 0), (0, 0)))
        sigma = jnp.pad(sigma, ((0, pad), (0, 0), (0, 0), (0, 0)),
                        constant_values=1.0)
        pi = jnp.pad(pi, ((0, pad), (0, 0), (0, 0)))
        tgt = jnp.pad(tgt, ((0, pad), (0, 0), (0, 0), (0, 0)))

    # Lane-dense layout: batch on the 128-lane axis, waypoints on sublanes;
    # K / D / M become leading axes so their reductions are pure VPU work.
    # (Loss-input tensors are tiny, so these layout transposes cost negligible HBM.)
    mu_t = jnp.transpose(mu, (2, 3, 1, 0))        # (K, D, W, Bp)
    sigma_t = jnp.transpose(sigma, (2, 3, 1, 0))  # (K, D, W, Bp)
    pi_t = jnp.transpose(pi, (2, 1, 0))           # (K, W, Bp)
    tgt_t = jnp.transpose(tgt, (1, 3, 2, 0))      # (M, D, W, Bp)

    out = pl.pallas_call(
        mdn_loss_kernel,
        out_shape=jax.ShapeDtypeStruct((1, Bp), jnp.float32),
        grid=(Bp // BB,),
        in_specs=[
            pl.BlockSpec((K, D, W, BB), lambda i: (0, 0, 0, i)),
            pl.BlockSpec((K, D, W, BB), lambda i: (0, 0, 0, i)),
            pl.BlockSpec((K, W, BB), lambda i: (0, 0, i)),
            pl.BlockSpec((M, D, W, BB), lambda i: (0, 0, 0, i)),
        ],
        out_specs=pl.BlockSpec((1, BB), lambda i: (0, i)),
        compiler_params=pltpu.CompilerParams(
            dimension_semantics=("parallel",)),
    )(mu_t, sigma_t, pi_t, tgt_t)
    return out[0, :B]


def mdn_loss_ref(mu, sigma, pi, targets, target_is_wh, waypoints_ix):
    """Pure-JAX reference following the PyTorch code step by step."""
    t = targets[:, :, waypoints_ix, :]                    # (B, M, W, D)
    t = jnp.transpose(t, (1, 0, 2, 3))                    # (M, B, W, D)
    if target_is_wh:
        t = jnp.flip(t, axis=-1)
    x = t[:, :, :, None, :]                               # (M, B, W, 1, D)
    z = (x - mu[None]) / sigma[None]                      # (M, B, W, K, D)
    comp_lp = jnp.sum(
        -0.5 * z * z - jnp.log(sigma[None]) - 0.5 * math.log(2.0 * math.pi),
        axis=-1)                                          # (M, B, W, K)
    log_mix = jax.nn.log_softmax(pi, axis=-1)             # (B, W, K)
    lp = jax.scipy.special.logsumexp(comp_lp + log_mix[None], axis=-1)  # (M, B, W)
    lp = jnp.transpose(lp, (1, 0, 2))                     # (B, M, W)
    return -jnp.mean(jnp.mean(lp, axis=-1), axis=-1)      # (B,)


if __name__ == "__main__":
    # Small, forward-consistent shapes.
    B, W, K, D = 2, 4, 5, 2      # batch, waypoints, mixture comps, event dim (x,y)
    M, T = 3, 8                  # target modes/agents, full trajectory length
    waypoints_ix = jnp.array([1, 3, 5, 7], dtype=jnp.int32)
    target_is_wh = True

    key = jax.random.PRNGKey(0)
    k1, k2, k3, k4 = jax.random.split(key, 4)
    mu = jax.random.normal(k1, (B, W, K, D), dtype=jnp.float32)
    sigma = jax.random.uniform(k2, (B, W, K, D), dtype=jnp.float32,
                               minval=0.5, maxval=1.5)
    pi = jax.random.normal(k3, (B, W, K), dtype=jnp.float32)
    targets = jax.random.normal(k4, (B, M, T, D), dtype=jnp.float32)

    loss = mdn_loss_pallas(mu, sigma, pi, targets, target_is_wh, waypoints_ix)
    loss = jax.block_until_ready(loss)

    ref = mdn_loss_ref(mu, sigma, pi, targets, target_is_wh, waypoints_ix)
    assert loss.shape == (B,), loss.shape
    assert jnp.allclose(loss, ref, rtol=1e-4, atol=1e-4), (loss, ref)
    print("KERNEL_OK")
</pallas_src>

<mosaic_0001>
module attributes {stable_mosaic.version = 11 : i64} {
  func.func @mdn_loss_kernel(%arg0: i32, %arg1: memref<5x2x4x2xf32, #tpu.memory_space<vmem>>, %arg2: memref<5x2x4x2xf32, #tpu.memory_space<vmem>>, %arg3: memref<5x4x2xf32, #tpu.memory_space<vmem>>, %arg4: memref<3x2x4x2xf32, #tpu.memory_space<vmem>>, %arg5: memref<1x2xf32, #tpu.memory_space<vmem>>) attributes {dimension_semantics = [#tpu.dimension_semantics<parallel>], iteration_bounds = array<i64: 1>, scalar_prefetch = 0 : i64, scratch_operands = 0 : i64, tpu.core_type = #tpu.core_type<tc>, window_params = [{transform_indices = @transform_0, window_bounds = array<i64: 5, 2, 4, 2>}, {transform_indices = @transform_1, window_bounds = array<i64: 5, 2, 4, 2>}, {transform_indices = @transform_2, window_bounds = array<i64: 5, 4, 2>}, {transform_indices = @transform_3, window_bounds = array<i64: 3, 2, 4, 2>}, {transform_indices = @transform_4, window_bounds = array<i64: 1, 2>}]} {
    %c0 = arith.constant 0 : index
    %c0_0 = arith.constant 0 : index
    %c0_1 = arith.constant 0 : index
    %c0_2 = arith.constant 0 : index
    %0 = vector.load %arg1[%c0, %c0_0, %c0_1, %c0_2] : memref<5x2x4x2xf32, #tpu.memory_space<vmem>>, vector<5x2x4x2xf32>
    %c0_3 = arith.constant 0 : index
    %c0_4 = arith.constant 0 : index
    %c0_5 = arith.constant 0 : index
    %c0_6 = arith.constant 0 : index
    %1 = vector.load %arg2[%c0_3, %c0_4, %c0_5, %c0_6] : memref<5x2x4x2xf32, #tpu.memory_space<vmem>>, vector<5x2x4x2xf32>
    %c0_7 = arith.constant 0 : index
    %c0_8 = arith.constant 0 : index
    %c0_9 = arith.constant 0 : index
    %2 = vector.load %arg3[%c0_7, %c0_8, %c0_9] : memref<5x4x2xf32, #tpu.memory_space<vmem>>, vector<5x4x2xf32>
    %c0_10 = arith.constant 0 : index
    %c0_11 = arith.constant 0 : index
    %c0_12 = arith.constant 0 : index
    %c0_13 = arith.constant 0 : index
    %3 = vector.load %arg4[%c0_10, %c0_11, %c0_12, %c0_13] : memref<3x2x4x2xf32, #tpu.memory_space<vmem>>, vector<3x2x4x2xf32>
    %cst = arith.constant 1.000000e+00 : f32
    %4 = vector.broadcast %cst : f32 to vector<5x2x4x2xf32>
    %5 = arith.divf %4, %1 : vector<5x2x4x2xf32>
    %6 = math.log %1 : vector<5x2x4x2xf32>
    %cst_14 = arith.constant dense<0.000000e+00> : vector<5x4x2xf32>
    %7 = vector.multi_reduction <add>, %6, %cst_14 [1] : vector<5x2x4x2xf32> to vector<5x4x2xf32>
    %cst_15 = arith.constant dense<0xFF800000> : vector<4x2xf32>
    %8 = vector.multi_reduction <maximumf>, %2, %cst_15 [0] : vector<5x4x2xf32> to vector<4x2xf32>
    %9 = vector.shape_cast %8 : vector<4x2xf32> to vector<1x4x2xf32>
    %10 = vector.broadcast %9 : vector<1x4x2xf32> to vector<5x4x2xf32>
    %11 = arith.subf %2, %10 : vector<5x4x2xf32>
    %12 = vector.broadcast %9 : vector<1x4x2xf32> to vector<5x4x2xf32>
    %13 = arith.subf %2, %12 : vector<5x4x2xf32>
    %14 = math.exp %13 : vector<5x4x2xf32>
    %cst_16 = arith.constant dense<0.000000e+00> : vector<4x2xf32>
    %15 = vector.multi_reduction <add>, %14, %cst_16 [0] : vector<5x4x2xf32> to vector<4x2xf32>
    %16 = vector.shape_cast %15 : vector<4x2xf32> to vector<1x4x2xf32>
    %17 = math.log %16 : vector<1x4x2xf32>
    %18 = vector.broadcast %17 : vector<1x4x2xf32> to vector<5x4x2xf32>
    %19 = arith.subf %11, %18 : vector<5x4x2xf32>
    %20 = vector.extract_strided_slice %3 {offsets = [0, 0, 0, 0], sizes = [3, 1, 4, 2], strides = [1, 1, 1, 1]} : vector<3x2x4x2xf32> to vector<3x1x4x2xf32>
    %21 = vector.shape_cast %20 : vector<3x1x4x2xf32> to vector<3x4x2xf32>
    %22 = vector.shape_cast %21 : vector<3x4x2xf32> to vector<3x1x4x2xf32>
    %23 = vector.extract_strided_slice %0 {offsets = [0, 0, 0, 0], sizes = [5, 1, 4, 2], strides = [1, 1, 1, 1]} : vector<5x2x4x2xf32> to vector<5x1x4x2xf32>
    %24 = vector.shape_cast %23 : vector<5x1x4x2xf32> to vector<5x4x2xf32>
    %25 = vector.shape_cast %24 : vector<5x4x2xf32> to vector<1x5x4x2xf32>
    %26 = vector.broadcast %22 : vector<3x1x4x2xf32> to vector<3x5x4x2xf32>
    %27 = vector.broadcast %25 : vector<1x5x4x2xf32> to vector<3x5x4x2xf32>
    %28 = arith.subf %26, %27 : vector<3x5x4x2xf32>
    %29 = vector.extract_strided_slice %5 {offsets = [0, 0, 0, 0], sizes = [5, 1, 4, 2], strides = [1, 1, 1, 1]} : vector<5x2x4x2xf32> to vector<5x1x4x2xf32>
    %30 = vector.shape_cast %29 : vector<5x1x4x2xf32> to vector<5x4x2xf32>
    %31 = vector.shape_cast %30 : vector<5x4x2xf32> to vector<1x5x4x2xf32>
    %32 = vector.broadcast %31 : vector<1x5x4x2xf32> to vector<3x5x4x2xf32>
    %33 = arith.mulf %28, %32 : vector<3x5x4x2xf32>
    %34 = arith.mulf %33, %33 : vector<3x5x4x2xf32>
    %35 = vector.extract_strided_slice %3 {offsets = [0, 1, 0, 0], sizes = [3, 1, 4, 2], strides = [1, 1, 1, 1]} : vector<3x2x4x2xf32> to vector<3x1x4x2xf32>
    %36 = vector.shape_cast %35 : vector<3x1x4x2xf32> to vector<3x4x2xf32>
    %37 = vector.shape_cast %36 : vector<3x4x2xf32> to vector<3x1x4x2xf32>
    %38 = vector.extract_strided_slice %0 {offsets = [0, 1, 0, 0], sizes = [5, 1, 4, 2], strides = [1, 1, 1, 1]} : vector<5x2x4x2xf32> to vector<5x1x4x2xf32>
    %39 = vector.shape_cast %38 : vector<5x1x4x2xf32> to vector<5x4x2xf32>
    %40 = vector.shape_cast %39 : vector<5x4x2xf32> to vector<1x5x4x2xf32>
    %41 = vector.broadcast %37 : vector<3x1x4x2xf32> to vector<3x5x4x2xf32>
    %42 = vector.broadcast %40 : vector<1x5x4x2xf32> to vector<3x5x4x2xf32>
    %43 = arith.subf %41, %42 : vector<3x5x4x2xf32>
    %44 = vector.extract_strided_slice %5 {offsets = [0, 1, 0, 0], sizes = [5, 1, 4, 2], strides = [1, 1, 1, 1]} : vector<5x2x4x2xf32> to vector<5x1x4x2xf32>
    %45 = vector.shape_cast %44 : vector<5x1x4x2xf32> to vector<5x4x2xf32>
    %46 = vector.shape_cast %45 : vector<5x4x2xf32> to vector<1x5x4x2xf32>
    %47 = vector.broadcast %46 : vector<1x5x4x2xf32> to vector<3x5x4x2xf32>
    %48 = arith.mulf %43, %47 : vector<3x5x4x2xf32>
    %49 = arith.mulf %48, %48 : vector<3x5x4x2xf32>
    %50 = arith.addf %34, %49 : vector<3x5x4x2xf32>
    %cst_17 = arith.constant -5.000000e-01 : f32
    %51 = vector.broadcast %cst_17 : f32 to vector<3x5x4x2xf32>
    %52 = arith.mulf %51, %50 : vector<3x5x4x2xf32>
    %53 = vector.shape_cast %7 : vector<5x4x2xf32> to vector<1x5x4x2xf32>
    %54 = vector.broadcast %53 : vector<1x5x4x2xf32> to vector<3x5x4x2xf32>
    %55 = arith.subf %52, %54 : vector<3x5x4x2xf32>
    %cst_18 = arith.constant 1.83787704 : f32
    %56 = vector.broadcast %cst_18 : f32 to vector<3x5x4x2xf32>
    %57 = arith.subf %55, %56 : vector<3x5x4x2xf32>
    %58 = vector.shape_cast %19 : vector<5x4x2xf32> to vector<1x5x4x2xf32>
    %59 = vector.broadcast %58 : vector<1x5x4x2xf32> to vector<3x5x4x2xf32>
    %60 = arith.addf %57, %59 : vector<3x5x4x2xf32>
    %cst_19 = arith.constant dense<0xFF800000> : vector<3x4x2xf32>
    %61 = vector.multi_reduction <maximumf>, %60, %cst_19 [1] : vector<3x5x4x2xf32> to vector<3x4x2xf32>
    %62 = vector.shape_cast %61 : vector<3x4x2xf32> to vector<3x1x4x2xf32>
    %63 = vector.shape_cast %62 : vector<3x1x4x2xf32> to vector<3x4x2xf32>
    %64 = vector.broadcast %62 : vector<3x1x4x2xf32> to vector<3x5x4x2xf32>
    %65 = arith.subf %60, %64 : vector<3x5x4x2xf32>
    %66 = math.exp %65 : vector<3x5x4x2xf32>
    %cst_20 = arith.constant dense<0.000000e+00> : vector<3x4x2xf32>
    %67 = vector.multi_reduction <add>, %66, %cst_20 [1] : vector<3x5x4x2xf32> to vector<3x4x2xf32>
    %68 = math.log %67 : vector<3x4x2xf32>
    %69 = arith.addf %63, %68 : vector<3x4x2xf32>
    %cst_21 = arith.constant dense<0.000000e+00> : vector<4x2xf32>
    %70 = vector.multi_reduction <add>, %69, %cst_21 [0] : vector<3x4x2xf32> to vector<4x2xf32>
    %cst_22 = arith.constant dense<0.000000e+00> : vector<2xf32>
    %71 = vector.multi_reduction <add>, %70, %cst_22 [0] : vector<4x2xf32> to vector<2xf32>
    %72 = vector.shape_cast %71 : vector<2xf32> to vector<1x2xf32>
    %cst_23 = arith.constant 0.0833333358 : f32
    %73 = vector.broadcast %cst_23 : f32 to vector<1x2xf32>
    %74 = arith.mulf %72, %73 : vector<1x2xf32>
    %cst_24 = arith.constant 0.000000e+00 : f32
    %75 = vector.broadcast %cst_24 : f32 to vector<1x2xf32>
    %76 = arith.subf %75, %74 : vector<1x2xf32>
    %c0_25 = arith.constant 0 : index
    %c0_26 = arith.constant 0 : index
    %77 = vector.load %arg5[%c0_25, %c0_26] : memref<1x2xf32, #tpu.memory_space<vmem>>, vector<1x2xf32>
    tpu.vector_store %arg5[%c0_25, %c0_26], %76 {strides = array<i32>} : memref<1x2xf32, #tpu.memory_space<vmem>>, vector<1x2xf32>,
    return
  }
  func.func @transform_0(%arg0: i32) -> (i32, i32, i32, i32) {
    %c0_i32 = arith.constant 0 : i32
    %c0_i32_0 = arith.constant 0 : i32
    %c0_i32_1 = arith.constant 0 : i32
    %c0_i32_2 = arith.constant 0 : i32
    return %c0_i32, %c0_i32_0, %c0_i32_1, %arg0 : i32, i32, i32, i32
  }
  func.func @transform_1(%arg0: i32) -> (i32, i32, i32, i32) {
    %c0_i32 = arith.constant 0 : i32
    %c0_i32_0 = arith.constant 0 : i32
    %c0_i32_1 = arith.constant 0 : i32
    %c0_i32_2 = arith.constant 0 : i32
    return %c0_i32, %c0_i32_0, %c0_i32_1, %arg0 : i32, i32, i32, i32
  }
  func.func @transform_2(%arg0: i32) -> (i32, i32, i32) {
    %c0_i32 = arith.constant 0 : i32
    %c0_i32_0 = arith.constant 0 : i32
    %c0_i32_1 = arith.constant 0 : i32
    return %c0_i32, %c0_i32_0, %arg0 : i32, i32, i32
  }
  func.func @transform_3(%arg0: i32) -> (i32, i32, i32, i32) {
    %c0_i32 = arith.constant 0 : i32
    %c0_i32_0 = arith.constant 0 : i32
    %c0_i32_1 = arith.constant 0 : i32
    %c0_i32_2 = arith.constant 0 : i32
    return %c0_i32, %c0_i32_0, %c0_i32_1, %arg0 : i32, i32, i32, i32
  }
  func.func @transform_4(%arg0: i32) -> (i32, i32) {
    %c0_i32 = arith.constant 0 : i32
    %c0_i32_0 = arith.constant 0 : i32
    return %c0_i32, %arg0 : i32, i32
  }
}

</mosaic_0001>

<bundles_post_ra>
// kernel: tpu_custom_call.1
= control target key start
LH: loop header
LB: loop body
LE: loop exit
PB: predicated region body
PF: predicated region fallthrough
CT: control target
= control target key end

     0   :  { %9 = vsyncpa [#allocation3], 0  ;;  %vm89_vm0 = vcmask 11264   ;;  %vm432_vm1 = vcmask 8192   ;;  %s1012_s0 = inlined_call_operand.vmem [shape: f32[5,2,4,2], index: 0, kind: input, shape index: {}]   ;;  %s1013_s1 = inlined_call_operand.vmem [shape: f32[5,2,4,2], index: 1, kind: input, shape index: {}]   ;;  %s1014_s2 = inlined_call_operand.vmem [shape: f32[5,4,2], index: 2, kind: input, shape index: {}]   ;;  %s1015_s3 = inlined_call_operand.vmem [shape: f32[3,2,4,2], index: 3, kind: input, shape index: {}]   ;;  %s1016_s4 = inlined_call_operand.hbm [shape: f32[1,2], index: 4, kind: output, shape index: {}]  }
   0x1   :  { %v28_v0 = vld [vmem:[%s1013_s1] sm:$0xf]  ;;  %v29_v1 = vld [vmem:[%s1013_s1 + $0x4] sm:$0xf]  ;;  %v30_v2 = vld [vmem:[%s1013_s1 + $0x8] sm:$0xf] }
   0x2   :  { %v31_v3 = vld [vmem:[%s1013_s1 + $0xc] sm:$0xf]  ;;  %464 = vrcp.f32 %v28_v0  ;;  %v617_v4 = vld [vmem:[%s1012_s0] sm:$0xf]  ;;  %v622_v5 = vld [vmem:[%s1012_s0 + $0x8] sm:$0xf] }
   0x3   :  { %v32_v6 = vld [vmem:[%s1013_s1 + $0x10] sm:$0xf]  ;;  %466 = vrcp.f32 %v29_v1  ;;  %v635_v8 = vld [vmem:[%s1012_s0 + $0x18] sm:$0xf]  ;;  %v33_v9 = vld [vmem:[%s1013_s1 + $0x14] sm:$0xf] }
   0x4   :  { %v630_v7 = vld [vmem:[%s1012_s0 + $0x10] sm:$0xf]  ;;  %468 = vrcp.f32 %v30_v2  ;;  %v643_v10 = vld [vmem:[%s1013_s1 + $0x18] sm:$0xf]  ;;  %v648_v11 = vld [vmem:[%s1013_s1 + $0x1c] sm:$0xf] }
   0x5   :  { %v653_v12 = vld [vmem:[%s1013_s1 + $0x20] sm:$0xf]  ;;  %470 = vrcp.f32 %v31_v3  ;;  %v40_v14 = vld [vmem:[%s1014_s2 + $0x8] sm:$0xf]  ;;  %v39_v16 = vld [vmem:[%s1014_s2 + $0x4] sm:$0xf] }
   0x6   :  { %v38_v13 = vld [vmem:[%s1014_s2] sm:$0xf]  ;;  %472 = vrcp.f32 %v32_v6  ;;  %v41_v17 = vld [vmem:[%s1014_s2 + $0xc] sm:$0xf]  ;;  %v42_v18 = vld [vmem:[%s1014_s2 + $0x10] sm:$0xf] }
   0x7   :  { %v664_v15 = vld [vmem:[%s1015_s3] sm:$0xf]  ;;  %474 = vrcp.f32 %v33_v9  ;;  %v685_v21 = vld [vmem:[%s1013_s1 + $0x24] sm:$0xf]  ;;  %v695_v24 = vld [vmem:[%s1015_s3 + $0x8] sm:$0xf] }
   0x8   :  { %v145_v19 = vsub.f32 %v664_v15, %v617_v4  ;;  %v680_v20 = vld [vmem:[%s1012_s0 + $0x20] sm:$0xf]  ;;  %476 = vrcp.f32 %v643_v10  ;;  %v146_v22 = vsub.f32 %v664_v15, %v622_v5  ;;  %v147_v23 = vsub.f32 %v664_v15, %v630_v7  ;;  %v709_v31 = vld [vmem:[%s1015_s3 + $0x10] sm:$0xf] }
   0x9   :  { %478 = vrcp.f32 %v648_v11  ;;  %v105_v25 = vsel %vm89_vm0, %v38_v13, -inf  ;;  %v107_v26 = vsel %vm89_vm0, %v40_v14, -inf  ;;  %v148_v27 = vsub.f32 %v664_v15, %v635_v8 }
   0xa   :  { %480 = vrcp.f32 %v653_v12  ;;  %v106_v28 = vsel %vm89_vm0, %v39_v16, -inf  ;;  %v108_v29 = vsel %vm89_vm0, %v41_v17, -inf  ;;  %v109_v30 = vsel %vm89_vm0, %v42_v18, -inf }
   0xb   :  { %482 = vrcp.f32 %v685_v21  ;;  %v110_v32 = vmax.f32 %v105_v25, %v109_v30  ;;  %v112_v33 = vmax.f32 %v107_v26, %v108_v29  ;;  %v149_v34 = vsub.f32 %v664_v15, %v680_v20 }
   0xc   :  { %v465_v35 = vpop.eup %464  ;;  %484 = vlog2.f32 %v28_v0  ;;  %v150_v36 = vsub.f32 %v695_v24, %v617_v4  ;;  %v151_v37 = vsub.f32 %v695_v24, %v622_v5  ;;  %v152_v38 = vsub.f32 %v695_v24, %v630_v7 }
   0xd   :  { %v720_v39 = vpop.eup %466  ;;  %486 = vlog2.f32 %v29_v1  ;;  %v111_v40 = vmax.f32 %v110_v32, %v106_v28  ;;  %v153_v41 = vsub.f32 %v695_v24, %v635_v8  ;;  %v154_v42 = vsub.f32 %v695_v24, %v680_v20 }
   0xe   :  { %v469_v43 = vpop.eup %468  ;;  %488 = vlog2.f32 %v30_v2  ;;  %v155_v44 = vsub.f32 %v709_v31, %v617_v4  ;;  %v156_v45 = vsub.f32 %v709_v31, %v622_v5  ;;  %v157_v46 = vsub.f32 %v709_v31, %v630_v7 }
   0xf   :  { %v732_v47 = vpop.eup %470  ;;  %490 = vlog2.f32 %v31_v3  ;;  %v113_v48 = vmax.f32 %v111_v40, %v112_v33  ;;  %v158_v49 = vsub.f32 %v709_v31, %v635_v8  ;;  %v159_v50 = vsub.f32 %v709_v31, %v680_v20 }
  0x10   :  { %v473_v51 = vpop.eup %472  ;;  %492 = vlog2.f32 %v32_v6  ;;  %v160_v52 = vmul.f32 %v465_v35, %v145_v19  ;;  %v161_v53 = vmul.f32 %v469_v43, %v146_v22  ;;  %v738_v54 = vmul.f32 %v465_v35, %v150_v36 }
  0x11   :  { %v740_v55 = vpop.eup %474  ;;  %494 = vlog2.f32 %v33_v9  ;;  %v742_v56 = vsub.f32 %v38_v13, %v113_v48  ;;  %v744_v57 = vsub.f32 %v39_v16, %v113_v48  ;;  %v746_v58 = vsub.f32 %v40_v14, %v113_v48 }
  0x12   :  { %v477_v59 = vpop.eup %476  ;;  %496 = vlog2.f32 %v643_v10  ;;  %v749_v60 = vsub.f32 %v41_v17, %v113_v48  ;;  %v751_v61 = vsub.f32 %v42_v18, %v113_v48  ;;  %v166_v62 = vmul.f32 %v469_v43, %v151_v37 }
  0x13   :  { %v753_v63 = vpop.eup %478  ;;  %498 = vlog2.f32 %v648_v11  ;;  %v119_v0 = vmul.f32 1.442695, %v742_v56  ;;  %v121_v1 = vmul.f32 1.442695, %v744_v57  ;;  %v758_v2 = vmul.f32 %v465_v35, %v155_v44 }
  0x14   :  { %v481_v3 = vpop.eup %480  ;;  %500 = vlog2.f32 %v653_v12  ;;  %v123_v4 = vmul.f32 1.442695, %v746_v58  ;;  %v125_v5 = vmul.f32 1.442695, %v749_v60  ;;  %v162_v6 = vmul.f32 %v473_v51, %v147_v23 }
  0x15   :  { %v763_v7 = vpop.eup %482  ;;  %502 = vlog2.f32 %v685_v21  ;;  %v127_v8 = vmul.f32 1.442695, %v751_v61  ;;  %v163_v9 = vmul.f32 %v477_v59, %v148_v27  ;;  %v164_v10 = vmul.f32 %v481_v3, %v149_v34 }
  0x16   :  { %v485_v11 = vpop.eup %484  ;;  %504 = vpow2.f32 %v119_v0  ;;  %v167_v13 = vmul.f32 %v473_v51, %v152_v38  ;;  %v168_v14 = vmul.f32 %v477_v59, %v153_v41  ;;  %v169_v15 = vmul.f32 %v481_v3, %v154_v42 }
  0x17   :  { %v487_v16 = vpop.eup %486  ;;  %v70_v12 = vmul.f32 0.6931472, %v485_v11  ;;  %506 = vpow2.f32 %v121_v1  ;;  %v171_v17 = vmul.f32 %v469_v43, %v156_v45  ;;  %v172_v18 = vmul.f32 %v473_v51, %v157_v46 }
  0x18   :  { %v489_v19 = vpop.eup %488  ;;  %v72_v20 = vmul.f32 0.6931472, %v487_v16  ;;  %508 = vpow2.f32 %v123_v4  ;;  %v173_v22 = vmul.f32 %v477_v59, %v158_v49  ;;  %v767_v23 = vmul.f32 %v481_v3, %v159_v50  ;;  %v795_v49 = vld [vmem:[%s1012_s0 + $0x4] sm:$0xf]  ;;  %v800_v50 = vld [vmem:[%s1012_s0 + $0xc] sm:$0xf] }
  0x19   :  { %v491_v21 = vpop.eup %490  ;;  %v74_v24 = vmul.f32 0.6931472, %v489_v19  ;;  %v90_v25 = vsel %vm89_vm0, %v70_v12, 0.0  ;;  %510 = vpow2.f32 %v125_v5  ;;  %v770_v26 = vmul.f32 %v160_v52, %v160_v52 }
  0x1a   :  { %v493_v27 = vpop.eup %492  ;;  %v76_v28 = vmul.f32 0.6931472, %v491_v21  ;;  %v91_v29 = vsel %vm89_vm0, %v72_v20, 0.0  ;;  %512 = vpow2.f32 %v127_v8  ;;  %v773_v30 = vmul.f32 %v161_v53, %v161_v53 }
  0x1b   :  { %v495_v31 = vpop.eup %494  ;;  %v78_v32 = vmul.f32 0.6931472, %v493_v27  ;;  %v93_v33 = vsel %vm89_vm0, %v74_v24, 0.0  ;;  %v776_v34 = vmul.f32 %v162_v6, %v162_v6  ;;  %v778_v35 = vmul.f32 %v163_v9, %v163_v9  ;;  %v44_v6 = vld [vmem:[%s1015_s3 + $0x4] sm:$0xf] }
  0x1c   :  { %v497_v36 = vpop.eup %496  ;;  %v80_v37 = vmul.f32 0.6931472, %v495_v31  ;;  %v780_v38 = vadd.f32 %v91_v29, %v90_v25  ;;  %v94_v40 = vsel %vm89_vm0, %v76_v28, 0.0  ;;  %v783_v41 = vmul.f32 %v164_v10, %v164_v10 }
  0x1d   :  { %v499_v42 = vpop.eup %498  ;;  %v82_v43 = vmul.f32 0.6931472, %v497_v36  ;;  %v96_v44 = vsel %vm89_vm0, %v78_v32, 0.0  ;;  %v788_v45 = vmul.f32 %v738_v54, %v738_v54  ;;  %v790_v46 = vmul.f32 %v166_v62, %v166_v62  ;;  %v810_v62 = vld [vmem:[%s1012_s0 + $0x14] sm:$0xf] }
  0x1e   :  { %v501_v48 = vpop.eup %500  ;;  %v84_v51 = vmul.f32 0.6931472, %v499_v42  ;;  %v802_v52 = vadd.f32 %v94_v40, %v93_v33  ;;  %v97_v53 = vsel %vm89_vm0, %v80_v37, 0.0  ;;  %v805_v54 = vmul.f32 %v167_v13, %v167_v13 }
  0x1f   :  { %v503_v59 = vpop.eup %502  ;;  %v86_v0 = vmul.f32 0.6931472, %v501_v48  ;;  %v99_v1 = vsel %vm89_vm0, %v82_v43, 0.0  ;;  %v813_v3 = vmul.f32 %v168_v14, %v168_v14  ;;  %v815_v4 = vmul.f32 %v169_v15, %v169_v15  ;;  %v25_v14 = vld [vmem:[%s1012_s0 + $0x1c] sm:$0xf] }
  0x20   :  { %v505_v5 = vpop.eup %504  ;;  %v88_v8 = vmul.f32 0.6931472, %v503_v59  ;;  %v820_v9 = vadd.f32 %v97_v53, %v96_v44  ;;  %v100_v10 = vsel %vm89_vm0, %v84_v51, 0.0  ;;  %v825_v11 = vmul.f32 %v758_v2, %v758_v2  ;;  %v27_v15 = vld [vmem:[%s1012_s0 + $0x24] sm:$0xf] }
  0x21   :  { %v507_v13 = vpop.eup %506  ;;  %v833_v16 = vadd.f32 %v100_v10, %v99_v1  ;;  %v129_v12 = vsel %vm89_vm0, %v505_v5, 0.0  ;;  %v836_v19 = vmul.f32 %v171_v17, %v171_v17  ;;  %v838_v20 = vmul.f32 %v172_v18, %v172_v18  ;;  %v46_v2 = vld [vmem:[%s1015_s3 + $0xc] sm:$0xf]  ;;  %v48_v17 = vld [vmem:[%s1015_s3 + $0x14] sm:$0xf]  ;;  %s576_s3 = smov [#allocation2]  }
  0x22   :  { %v509_v21 = vpop.eup %508  ;;  %v844_v24 = vsel %vm89_vm0, %v86_v0, 0.0  ;;  %v847_v25 = vsel %vm89_vm0, %v88_v8, 0.0  ;;  %v130_v27 = vsel %vm89_vm0, %v507_v13, 0.0  ;;  %v850_v28 = vmul.f32 %v173_v22, %v173_v22  ;;  %s440_s22 = sshll.u32 %s576_s3, 4  ;;  %s441_s22 = int_to_ptr.vmem [resolvable:$true] %s440_s22 }
  0x23   :  { %v511_v29 = vpop.eup %510  ;;  %v131_v18 = vadd.f32 %v130_v27, %v129_v12  ;;  %v132_v31 = vsel %vm89_vm0, %v509_v21, 0.0  ;;  %v190_v32 = vsub.f32 %v44_v6, %v795_v49  ;;  %v191_v33 = vsub.f32 %v44_v6, %v800_v50  ;;  %s552_s23 = scalar_lea.vmem %s441_s22, 16  ;;  %s556_s24 = scalar_lea.vmem %s441_s22, 32 }
  0x24   :  { %v513_v36 = vpop.eup %512  ;;  %v134_v37 = vsel %vm89_vm0, %v511_v29, 0.0  ;;  %v192_v40 = vsub.f32 %v44_v6, %v810_v62  ;;  %v193_v42 = vsub.f32 %v44_v6, %v25_v14  ;;  %v194_v22 = vsub.f32 %v44_v6, %v27_v15  ;;  %p553_p0 = scmp.ne.s32.totalorder %s441_s22, %s552_s23  ;;  %p557_p1 = scmp.lt.s32.totalorder %s441_s22, %s441_s22 }
  0x25   :  { %v133_v43 = vadd.f32 %v132_v31, %v131_v18  ;;  %v136_v44 = vsel %vm89_vm0, %v513_v36, 0.0  ;;  %v195_v48 = vsub.f32 %v46_v2, %v795_v49  ;;  %v196_v51 = vsub.f32 %v46_v2, %v800_v50  ;;  %p558_p2 = scmp.lt.s32.totalorder %s556_s24, %s552_s23 }
  0x26   :  { %v197_v53 = vsub.f32 %v46_v2, %v810_v62  ;;  %v198_v59 = vsub.f32 %v46_v2, %v25_v14  ;;  %v199_v0 = vsub.f32 %v46_v2, %v27_v15  ;;  %v200_v1 = vsub.f32 %v48_v17, %v795_v49 }
  0x27   :  { %v135_v5 = vadd.f32 %v134_v37, %v133_v43  ;;  %v201_v8 = vsub.f32 %v48_v17, %v800_v50  ;;  %v202_v10 = vsub.f32 %v48_v17, %v810_v62  ;;  %v203_v13 = vsub.f32 %v48_v17, %v25_v14  ;;  %p559_p3 = por %p558_p2, %p557_p1 }
  0x28   :  { %v204_v6 = vsub.f32 %v48_v17, %v27_v15  ;;  %v205_v12 = vmul.f32 %v720_v39, %v190_v32  ;;  %v206_v21 = vmul.f32 %v732_v47, %v191_v33  ;;  %v207_v27 = vmul.f32 %v740_v55, %v192_v40 }
  0x29   :  { %v137_v29 = vadd.f32 %v136_v44, %v135_v5  ;;  %v208_v18 = vmul.f32 %v753_v63, %v193_v42  ;;  %v209_v2 = vmul.f32 %v763_v7, %v194_v22  ;;  %v210_v49 = vmul.f32 %v720_v39, %v195_v48  ;;  %p560_p4 = pnand %p559_p3, %p553_p0 }
  0x2a   :  { %v211_v31 = vmul.f32 %v732_v47, %v196_v51  ;;  %v212_v50 = vmul.f32 %v740_v55, %v197_v53  ;;  %v213_v62 = vmul.f32 %v753_v63, %v198_v59  ;;  %v214_v14 = vmul.f32 %v763_v7, %v199_v0 }
  0x2b   :  { %514 = vlog2.f32 %v137_v29  ;;  %v215_v15 = vmul.f32 %v720_v39, %v200_v1  ;;  %v216_v17 = vmul.f32 %v732_v47, %v201_v8  ;;  %v217_v32 = vmul.f32 %v740_v55, %v202_v10 }
  0x2c   :  { %v218_v33 = vmul.f32 %v753_v63, %v203_v13  ;;  %v219_v36 = vmul.f32 %v763_v7, %v204_v6  ;;  %v220_v37 = vmul.f32 %v205_v12, %v205_v12  ;;  %v221_v40 = vmul.f32 %v206_v21, %v206_v21 }
  0x2d   :  { %v222_v42 = vmul.f32 %v207_v27, %v207_v27  ;;  %v223_v22 = vmul.f32 %v208_v18, %v208_v18  ;;  %v224_v43 = vmul.f32 %v209_v2, %v209_v2  ;;  %v225_v44 = vmul.f32 %v210_v49, %v210_v49 }
  0x2e   :  { %v189_v48 = vmul.f32 %v767_v23, %v767_v23  ;;  %v226_v51 = vmul.f32 %v211_v31, %v211_v31  ;;  %v227_v53 = vmul.f32 %v212_v50, %v212_v50  ;;  %v228_v39 = vmul.f32 %v213_v62, %v213_v62 }
  0x2f   :  { %v229_v59 = vmul.f32 %v214_v14, %v214_v14  ;;  %v230_v47 = vmul.f32 %v215_v15, %v215_v15  ;;  %v231_v0 = vmul.f32 %v216_v17, %v216_v17  ;;  %v232_v55 = vmul.f32 %v217_v32, %v217_v32 }
  0x30   :  { %v233_v1 = vmul.f32 %v218_v33, %v218_v33  ;;  %v234_v63 = vmul.f32 %v219_v36, %v219_v36  ;;  %v235_v7 = vadd.f32 %v220_v37, %v770_v26  ;;  %v236_v5 = vadd.f32 %v221_v40, %v773_v30 }
  0x31   :  { %v237_v8 = vadd.f32 %v222_v42, %v776_v34  ;;  %v238_v10 = vadd.f32 %v223_v22, %v778_v35  ;;  %v239_v13 = vadd.f32 %v224_v43, %v783_v41  ;;  %v240_v23 = vadd.f32 %v225_v44, %v788_v45 }
  0x32   :  { %v892_v6 = vadd.f32 %v847_v25, %v844_v24  ;;  %v241_v12 = vadd.f32 %v226_v51, %v790_v46  ;;  %v242_v21 = vadd.f32 %v227_v53, %v805_v54  ;;  %v243_v26 = vadd.f32 %v228_v39, %v813_v3 }
  0x33   :  { %v244_v30 = vadd.f32 %v229_v59, %v815_v4  ;;  %v245_v34 = vadd.f32 %v230_v47, %v825_v11  ;;  %v246_v35 = vadd.f32 %v231_v0, %v836_v19  ;;  %v247_v41 = vadd.f32 %v232_v55, %v838_v20 }
  0x34   :  { %v248_v45 = vadd.f32 %v233_v1, %v850_v28  ;;  %v249_v27 = vadd.f32 %v234_v63, %v189_v48  ;;  %v250_v29 = vmul.f32 -0.5, %v235_v7  ;;  %v251_v24 = vmul.f32 -0.5, %v236_v5 }
  0x35   :  { %v515_v25 = vpop.eup %514  ;;  %v252_v18 = vmul.f32 -0.5, %v237_v8  ;;  %v253_v46 = vmul.f32 -0.5, %v238_v10  ;;  %v254_v2 = vmul.f32 -0.5, %v239_v13  ;;  %v255_v54 = vmul.f32 -0.5, %v240_v23 }
  0x36   :  { %v139_v49 = vmul.f32 0.6931472, %v515_v25  ;;  %v256_v3 = vmul.f32 -0.5, %v241_v12  ;;  %v257_v31 = vmul.f32 -0.5, %v242_v21  ;;  %v258_v4 = vmul.f32 -0.5, %v243_v26 }
  0x37   :  { %v259_v50 = vmul.f32 -0.5, %v244_v30  ;;  %v260_v11 = vmul.f32 -0.5, %v245_v34  ;;  %v261_v62 = vmul.f32 -0.5, %v246_v35  ;;  %v262_v19 = vmul.f32 -0.5, %v247_v41 }
  0x38   :  { %v140_v20 = vsub.f32 %v742_v56, %v139_v49  ;;  %v141_v28 = vsub.f32 %v744_v57, %v139_v49  ;;  %v263_v14 = vmul.f32 -0.5, %v248_v45  ;;  %v264_v15 = vmul.f32 -0.5, %v249_v27 }
  0x39   :  { %v142_v17 = vsub.f32 %v746_v58, %v139_v49  ;;  %v265_v32 = vsub.f32 %v250_v29, %v780_v38  ;;  %v266_v33 = vsub.f32 %v251_v24, %v802_v52  ;;  %v267_v36 = vsub.f32 %v252_v18, %v820_v9 }
  0x3a   :  { %v143_v37 = vsub.f32 %v749_v60, %v139_v49  ;;  %v268_v40 = vsub.f32 %v253_v46, %v833_v16  ;;  %v269_v42 = vsub.f32 %v254_v2, %v892_v6  ;;  %v270_v56 = vsub.f32 %v255_v54, %v780_v38 }
  0x3b   :  { %v271_v57 = vsub.f32 %v256_v3, %v802_v52  ;;  %v272_v22 = vsub.f32 %v257_v31, %v820_v9  ;;  %v273_v58 = vsub.f32 %v258_v4, %v833_v16  ;;  %v274_v43 = vsub.f32 %v259_v50, %v892_v6 }
  0x3c   :  { %v275_v44 = vsub.f32 %v260_v11, %v780_v38  ;;  %v276_v48 = vsub.f32 %v261_v62, %v802_v52  ;;  %v277_v60 = vsub.f32 %v262_v19, %v820_v9  ;;  %v278_v51 = vsub.f32 %v263_v14, %v833_v16 }
  0x3d   :  { %v279_v53 = vsub.f32 %v264_v15, %v892_v6  ;;  %v448_v39 = vadd.f32 -1.837877, %v265_v32  ;;  %v449_v59 = vadd.f32 -1.837877, %v266_v33  ;;  %v450_v47 = vadd.f32 -1.837877, %v267_v36 }
  0x3e   :  { %v144_v0 = vsub.f32 %v751_v61, %v139_v49  ;;  %v451_v55 = vadd.f32 -1.837877, %v268_v40  ;;  %v452_v1 = vadd.f32 -1.837877, %v269_v42  ;;  %v453_v63 = vadd.f32 -1.837877, %v270_v56 }
  0x3f   :  { %v454_v7 = vadd.f32 -1.837877, %v271_v57  ;;  %v455_v5 = vadd.f32 -1.837877, %v272_v22  ;;  %v456_v8 = vadd.f32 -1.837877, %v273_v58  ;;  %v295_v38 = vadd.f32 %v448_v39, %v140_v20 }
  0x40   :  { %v457_v10 = vadd.f32 -1.837877, %v274_v43  ;;  %v458_v52 = vadd.f32 -1.837877, %v275_v44  ;;  %v459_v13 = vadd.f32 -1.837877, %v276_v48  ;;  %v296_v9 = vadd.f32 %v449_v59, %v141_v28 }
  0x41   :  { %v460_v23 = vadd.f32 -1.837877, %v277_v60  ;;  %v461_v16 = vadd.f32 -1.837877, %v278_v51  ;;  %v462_v12 = vadd.f32 -1.837877, %v279_v53  ;;  %v297_v6 = vadd.f32 %v450_v47, %v142_v17 }
  0x42   :  { %v298_v21 = vadd.f32 %v451_v55, %v143_v37  ;;  %v299_v26 = vadd.f32 %v452_v1, %v144_v0  ;;  %v300_v30 = vadd.f32 %v453_v63, %v140_v20  ;;  %v301_v34 = vadd.f32 %v454_v7, %v141_v28 }
  0x43   :  { %v302_v61 = vadd.f32 %v455_v5, %v142_v17  ;;  %v303_v35 = vadd.f32 %v456_v8, %v143_v37  ;;  %v304_v41 = vadd.f32 %v457_v10, %v144_v0  ;;  %v922_v45 = vadd.f32 %v458_v52, %v140_v20 }
  0x44   :  { %v924_v27 = vadd.f32 %v459_v13, %v141_v28  ;;  %v926_v29 = vadd.f32 %v460_v23, %v142_v17  ;;  %v928_v24 = vadd.f32 %v461_v16, %v143_v37  ;;  %v930_v25 = vadd.f32 %v462_v12, %v144_v0 }
  0x45   :  { %v310_v18 = vsel %vm89_vm0, %v295_v38, -inf  ;;  %v311_v46 = vsel %vm89_vm0, %v296_v9, -inf  ;;  %v312_v2 = vsel %vm89_vm0, %v297_v6, -inf  ;;  %v314_v54 = vsel %vm89_vm0, %v298_v21, -inf }
  0x46   :  { %v313_v49 = vmax.f32 %v310_v18, %v312_v2  ;;  %v315_v3 = vmax.f32 %v311_v46, %v314_v54  ;;  %v316_v31 = vsel %vm89_vm0, %v299_v26, -inf  ;;  %v319_v4 = vsel %vm89_vm0, %v300_v30, -inf }
  0x47   :  { %v320_v50 = vsel %vm89_vm0, %v301_v34, -inf  ;;  %v321_v11 = vsel %vm89_vm0, %v302_v61, -inf  ;;  %v323_v62 = vsel %vm89_vm0, %v303_v35, -inf  ;;  %v325_v19 = vsel %vm89_vm0, %v304_v41, -inf }
  0x48   :  { %v317_v20 = vmax.f32 %v313_v49, %v316_v31  ;;  %v322_v28 = vmax.f32 %v319_v4, %v321_v11  ;;  %v324_v14 = vmax.f32 %v320_v50, %v323_v62  ;;  %v328_v15 = vsel %vm89_vm0, %v922_v45, -inf }
  0x49   :  { %v329_v17 = vsel %vm89_vm0, %v924_v27, -inf  ;;  %v330_v32 = vsel %vm89_vm0, %v926_v29, -inf  ;;  %v332_v33 = vsel %vm89_vm0, %v928_v24, -inf  ;;  %v334_v36 = vsel %vm89_vm0, %v930_v25, -inf }
  0x4a   :  { %v952_v37 = vmax.f32 %v317_v20, %v315_v3  ;;  %v326_v40 = vmax.f32 %v322_v28, %v325_v19  ;;  %v331_v42 = vmax.f32 %v328_v15, %v330_v32  ;;  %v333_v56 = vmax.f32 %v329_v17, %v332_v33 }
  0x4c   :  { %v954_v57 = vmax.f32 %v326_v40, %v324_v14  ;;  %v335_v22 = vmax.f32 %v331_v42, %v334_v36  ;;  %v337_v58 = vsub.f32 %v295_v38, %v952_v37  ;;  %v338_v43 = vsub.f32 %v296_v9, %v952_v37 }
  0x4d   :  { %v339_v44 = vsub.f32 %v297_v6, %v952_v37  ;;  %v340_v48 = vsub.f32 %v298_v21, %v952_v37  ;;  %v341_v60 = vsub.f32 %v299_v26, %v952_v37 }
  0x4e   :  { %v342_v51 = vsub.f32 %v300_v30, %v954_v57  ;;  %v962_v53 = vmax.f32 %v335_v22, %v333_v56  ;;  %v343_v39 = vsub.f32 %v301_v34, %v954_v57  ;;  %v352_v59 = vmul.f32 1.442695, %v337_v58 }
  0x4f   :  { %v354_v47 = vmul.f32 1.442695, %v338_v43  ;;  %v344_v0 = vsub.f32 %v302_v61, %v954_v57  ;;  %v345_v55 = vsub.f32 %v303_v35, %v954_v57  ;;  %v356_v1 = vmul.f32 1.442695, %v339_v44 }
  0x50   :  { %516 = vpow2.f32 %v352_v59  ;;  %v358_v63 = vmul.f32 1.442695, %v340_v48  ;;  %v346_v7 = vsub.f32 %v304_v41, %v954_v57  ;;  %v360_v5 = vmul.f32 1.442695, %v341_v60 }
  0x51   :  { %518 = vpow2.f32 %v354_v47  ;;  %v362_v8 = vmul.f32 1.442695, %v342_v51  ;;  %v347_v38 = vsub.f32 %v922_v45, %v962_v53  ;;  %v364_v10 = vmul.f32 1.442695, %v343_v39 }
  0x52   :  { %520 = vpow2.f32 %v356_v1  ;;  %v348_v52 = vsub.f32 %v924_v27, %v962_v53  ;;  %v366_v13 = vmul.f32 1.442695, %v344_v0  ;;  %v349_v9 = vsub.f32 %v926_v29, %v962_v53 }
  0x53   :  { %522 = vpow2.f32 %v358_v63  ;;  %v368_v23 = vmul.f32 1.442695, %v345_v55  ;;  %v350_v16 = vsub.f32 %v928_v24, %v962_v53  ;;  %v370_v12 = vmul.f32 1.442695, %v346_v7 }
  0x54   :  { %524 = vpow2.f32 %v360_v5  ;;  %v351_v6 = vsub.f32 %v930_v25, %v962_v53  ;;  %v372_v21 = vmul.f32 1.442695, %v347_v38  ;;  %v374_v26 = vmul.f32 1.442695, %v348_v52 }
  0x55   :  { %526 = vpow2.f32 %v362_v8  ;;  %v376_v30 = vmul.f32 1.442695, %v349_v9  ;;  %v378_v34 = vmul.f32 1.442695, %v350_v16 }
  0x56   :  { %528 = vpow2.f32 %v364_v10  ;;  %v380_v35 = vmul.f32 1.442695, %v351_v6 }
  0x57   :  { %530 = vpow2.f32 %v366_v13 }
  0x58   :  { %532 = vpow2.f32 %v368_v23 }
  0x59   :  { %534 = vpow2.f32 %v370_v12 }
  0x5a   :  { %v517_v61 = vpop.eup %516  ;;  %536 = vpow2.f32 %v372_v21 }
  0x5b   :  { %v519_v41 = vpop.eup %518  ;;  %538 = vpow2.f32 %v374_v26  ;;  %v382_v45 = vsel %vm89_vm0, %v517_v61, 0.0 }
  0x5c   :  { %v521_v27 = vpop.eup %520  ;;  %540 = vpow2.f32 %v376_v30  ;;  %v383_v29 = vsel %vm89_vm0, %v519_v41, 0.0 }
  0x5d   :  { %v523_v24 = vpop.eup %522  ;;  %542 = vpow2.f32 %v378_v34  ;;  %v384_v25 = vadd.f32 %v383_v29, %v382_v45  ;;  %v385_v18 = vsel %vm89_vm0, %v521_v27, 0.0 }
  0x5e   :  { %v525_v46 = vpop.eup %524  ;;  %544 = vpow2.f32 %v380_v35  ;;  %v387_v2 = vsel %vm89_vm0, %v523_v24, 0.0 }
  0x5f   :  { %v527_v54 = vpop.eup %526  ;;  %v386_v49 = vadd.f32 %v385_v18, %v384_v25  ;;  %v389_v31 = vsel %vm89_vm0, %v525_v46, 0.0 }
  0x60   :  { %v529_v3 = vpop.eup %528  ;;  %v391_v4 = vsel %vm89_vm0, %v527_v54, 0.0 }
  0x61   :  { %v531_v50 = vpop.eup %530  ;;  %v388_v11 = vadd.f32 %v387_v2, %v386_v49  ;;  %v392_v62 = vsel %vm89_vm0, %v529_v3, 0.0 }
  0x62   :  { %v533_v19 = vpop.eup %532  ;;  %v393_v20 = vadd.f32 %v392_v62, %v391_v4  ;;  %v394_v28 = vsel %vm89_vm0, %v531_v50, 0.0 }
  0x63   :  { %v535_v14 = vpop.eup %534  ;;  %v390_v15 = vadd.f32 %v389_v31, %v388_v11  ;;  %v396_v17 = vsel %vm89_vm0, %v533_v19, 0.0 }
  0x64   :  { %v537_v32 = vpop.eup %536  ;;  %v395_v33 = vadd.f32 %v394_v28, %v393_v20  ;;  %v398_v40 = vsel %vm89_vm0, %v535_v14, 0.0 }
  0x65   :  { %v539_v36 = vpop.eup %538  ;;  %v400_v42 = vsel %vm89_vm0, %v537_v32, 0.0  ;;  %546 = vlog2.f32 %v390_v15 }
  0x66   :  { %v541_v56 = vpop.eup %540  ;;  %v397_v22 = vadd.f32 %v396_v17, %v395_v33  ;;  %v401_v58 = vsel %vm89_vm0, %v539_v36, 0.0 }
  0x67   :  { %v543_v43 = vpop.eup %542  ;;  %v402_v44 = vadd.f32 %v401_v58, %v400_v42  ;;  %v403_v48 = vsel %vm89_vm0, %v541_v56, 0.0 }
  0x68   :  { %v545_v60 = vpop.eup %544  ;;  %v399_v51 = vadd.f32 %v398_v40, %v397_v22  ;;  %v405_v39 = vsel %vm89_vm0, %v543_v43, 0.0 }
  0x69   :  { %v404_v59 = vadd.f32 %v403_v48, %v402_v44  ;;  %v407_v47 = vsel %vm89_vm0, %v545_v60, 0.0 }
  0x6a   :  { %548 = vlog2.f32 %v399_v51 }
  0x6b   :  { %v406_v0 = vadd.f32 %v405_v39, %v404_v59 }
  0x6d   :  { %v408_v55 = vadd.f32 %v407_v47, %v406_v0 }
  0x6f   :  { %v547_v1 = vpop.eup %546  ;;  %550 = vlog2.f32 %v408_v55 }
  0x70   :  { %v410_v63 = vmul.f32 0.6931472, %v547_v1 }
  0x72   :  { %v415_v5 = vadd.f32 %v410_v63, %v952_v37 }
  0x74   :  { %v549_v7 = vpop.eup %548  ;;  %v418_v10 = vsel %vm89_vm0, %v415_v5, 0.0 }
  0x75   :  { %v412_v8 = vmul.f32 0.6931472, %v549_v7 }
  0x77   :  { %v416_v38 = vadd.f32 %v412_v8, %v954_v57 }
  0x79   :  { %v551_v52 = vpop.eup %550  ;;  %v419_v13 = vsel %vm89_vm0, %v416_v38, 0.0 }
  0x7a   :  { %v414_v9 = vmul.f32 0.6931472, %v551_v52  ;;  %v420_v23 = vadd.f32 %v419_v13, %v418_v10 }
  0x7c   :  { %v417_v16 = vadd.f32 %v414_v9, %v962_v53 }
  0x7e   :  { %v421_v12 = vsel %vm89_vm0, %v417_v16, 0.0 }
  0x7f   :  { %v422_v6 = vadd.f32 %v421_v12, %v420_v23 }
  0x81   :  { %v423_v21 = vsel %vm89_vm0, %v422_v6, 0.0 }
  0x82   :  { %v424_v26 = vrot.slane %v423_v21, 4 }
  0x84   :  { %v425_v30 = vadd.f32 %v424_v26, %v423_v21 }
  0x86   :  { %v426_v37 = vrot.slane %v425_v30, 2 }
  0x88   :  { %v427_v34 = vadd.f32 %v426_v37, %v425_v30 }
  0x8a   :  { %v428_v61 = vrot.slane %v427_v34, 1 }
  0x8c   :  { %v429_v57 = vadd.f32 %v428_v61, %v427_v34 }
  0x8e   :  { %v430_v35 = vmul.f32 0.083333336, %v429_v57 }
  0x90   :  { %v431_v41 = vsub.f32 0.0, %v430_v35 }
  0x92   :  { %433 = vst.msk [vmem:[#allocation2] sm:$0x1] %vm432_vm1, %v431_v41 }
  0x93   :  { %563 = shalt.err (!%p560_p4)
}
  0x94   :  { %s564_s27 = scalar_lea.hbm %s1016_s4, 16 }
  0x95   :  { %p565_p5 = scmp.ne.s32.totalorder %s1016_s4, %s564_s27  ;;  %p568_p6 = scmp.lt.u32.totalorder %s564_s27, %s1016_s4 }
  0x97   :  { %p570_p7 = pnand %p568_p6, %p565_p5 }
  0x99   :  { %573 = shalt.err (!%p570_p7)
}
  0x9a   :  { %443 = dma.vmem_to_hbm [thread:$0]  %s441_s22, 16, %s1016_s4, [#allocation3]  }
  0x9b   :  { %574 = dma.done.wait [#allocation3], 16  }
  0x9c   :  { %575 = vsyncadd [#allocation3], 4294967280 }
  0x9d   :  { %447 = vsyncpa [#allocation3], 1 }

</bundles_post_ra>
